<compile_context>
chip_gen: v6e
topology: v6e:2x2x1
jax: 0.10.0
libtpu: 0.0.40
codegen_flags: <defaults>
</compile_context>

<pallas_src>
import numpy as np
import jax
import jax.numpy as jnp
from jax.experimental import pallas as pl
from jax.experimental.pallas import tpu as pltpu

INPUT_SIZE = 768          # feature size of x_cond
OUTPUT_SIZE = 86          # feature size of x_to_film
BLOCKS = 3
NUM_FILM = 1
SEQ = 256                 # max_seq_length implied by the module's assert
FILM_OUT = OUTPUT_SIZE * NUM_FILM * 2   # 172
TB_MAX = 16               # batch elements per grid step


def _build_constants():
    """Precompute the column-replication matrix and the block-diagonal mask."""
    cols = np.arange(SEQ)
    rows = np.arange(SEQ)
    # S[j, c] = 1 iff output column c reads feature column j == c mod 86
    # (reproduces concat([film, film, film[:, :84]]) along lanes).
    s = (cols[None, :] % OUTPUT_SIZE == np.arange(OUTPUT_SIZE)[:, None]
         ).astype(np.float32)                                   # (86, 256)
    # Keep only positions whose row block equals their column block.
    mask = ((rows[:, None] // OUTPUT_SIZE) ==
            (cols[None, :] // OUTPUT_SIZE)).astype(np.float32)  # (256, 256)
    return s, mask


_S_NP, _MASK_NP = _build_constants()


def cbda_kernel(gp1_ref, beta_ref, xf_ref, s_ref, mask_ref, o_ref):
    """TB batch elements per grid step.

    gp1_ref  : (TB, 1, 86)    1 + gamma (f32)
    beta_ref : (TB, 1, 86)    beta (f32)
    xf_ref   : (TB, 256, 86)  tensor to FiLM
    s_ref    : (86, 256)      resident 0/1 column-replication matrix
    mask_ref : (256, 256)     resident block-diagonal mask
    o_ref    : (TB, 256, 256) output
    """
    tb = xf_ref.shape[0]

    # --- FiLM (VPU): (TB,1,86) broadcasts over the 256-row sublane axis ----
    film = gp1_ref[...] * xf_ref[...].astype(jnp.float32) + beta_ref[...]

    # --- Block-diagonal placement -----------------------------------------
    # Column replication c -> c mod 86 on the MXU (exact with a 0/1 matrix),
    # then zero the off-diagonal blocks with one VPU multiply.
    shifted = jnp.dot(film.reshape(tb * SEQ, OUTPUT_SIZE), s_ref[...],
                      preferred_element_type=jnp.float32)        # (TB*256, 256)
    out = shifted.reshape(tb, SEQ, SEQ) * mask_ref[...]
    o_ref[...] = out.astype(o_ref.dtype)


def cbda_forward(x_cond, x_to_film, weight_t, bias, *, tb=TB_MAX):
    """x_cond: (B, 768), x_to_film: (B, 256, 86) -> (B, 256, 256)."""
    B = x_cond.shape[0]
    out_dtype = x_to_film.dtype

    # --- Linear hoisted to XLA (M=B matmul; poor MXU fit inside the kernel) -
    gb = (x_cond.astype(jnp.float32) @ weight_t.astype(jnp.float32)
          + bias.astype(jnp.float32))                             # (B, 172)
    gp1 = (1.0 + gb[:, :OUTPUT_SIZE]).reshape(B, 1, OUTPUT_SIZE)  # (B,1,86)
    beta = gb[:, OUTPUT_SIZE:].reshape(B, 1, OUTPUT_SIZE)         # (B,1,86)

    # --- Batch tiling: no wrapper-side padding, Pallas handles ragged edge --
    tb = max(1, min(tb, B))
    grid_b = pl.cdiv(B, tb)

    s_mat = jnp.asarray(_S_NP)
    mask = jnp.asarray(_MASK_NP)

    out = pl.pallas_call(
        cbda_kernel,
        out_shape=jax.ShapeDtypeStruct((B, SEQ, SEQ), out_dtype),
        grid_spec=pltpu.PrefetchScalarGridSpec(
            num_scalar_prefetch=0,
            grid=(grid_b,),
            in_specs=[
                pl.BlockSpec((tb, 1, OUTPUT_SIZE), lambda b: (b, 0, 0)),
                pl.BlockSpec((tb, 1, OUTPUT_SIZE), lambda b: (b, 0, 0)),
                pl.BlockSpec((tb, SEQ, OUTPUT_SIZE), lambda b: (b, 0, 0)),
                pl.BlockSpec((OUTPUT_SIZE, SEQ), lambda b: (0, 0)),   # resident
                pl.BlockSpec((SEQ, SEQ), lambda b: (0, 0)),           # resident
            ],
            out_specs=pl.BlockSpec((tb, SEQ, SEQ), lambda b: (b, 0, 0)),
        ),
        compiler_params=pltpu.CompilerParams(
            dimension_semantics=("parallel",),
            vmem_limit_bytes=32 * 1024 * 1024,
        ),
    )(gp1, beta, x_to_film, s_mat, mask)

    return out


def cbda_reference(x_cond, x_to_film, weight_t, bias):
    """Pure-JAX reference mirroring the PyTorch forward."""
    gb = x_cond @ weight_t + bias                      # (B, 172)
    gamma = gb[:, None, :OUTPUT_SIZE]                  # (B, 1, 86)
    beta = gb[:, None, OUTPUT_SIZE:]                   # (B, 1, 86)
    out = (1.0 + gamma) * x_to_film + beta             # (B, 256, 86)
    res = []
    for b in range(out.shape[0]):
        chunks = [out[b, :86], out[b, 86:172], out[b, 172:]]
        bd = jnp.zeros((SEQ, BLOCKS * OUTPUT_SIZE), out.dtype)
        r = 0
        c = 0
        for ch in chunks:
            bd = bd.at[r:r + ch.shape[0], c:c + OUTPUT_SIZE].set(ch)
            r += ch.shape[0]
            c += OUTPUT_SIZE
        res.append(bd)
    stacked = jnp.stack(res)                            # (B, 256, 258)
    return stacked[:, :, :SEQ]                          # (B, 256, 256)


if __name__ == "__main__":
    key = jax.random.PRNGKey(0)
    k1, k2, k3 = jax.random.split(key, 3)

    B = 2
    x_cond = jax.random.normal(k1, (B, INPUT_SIZE), dtype=jnp.float32)
    x_to_film = jax.random.normal(k2, (B, SEQ, OUTPUT_SIZE), dtype=jnp.float32)

    # nn.Linear(768, 172): weight ~ U(-1/sqrt(768), 1/sqrt(768)), bias filled with 0.
    bound = 1.0 / (INPUT_SIZE ** 0.5)
    weight_t = jax.random.uniform(
        k3, (INPUT_SIZE, FILM_OUT), dtype=jnp.float32, minval=-bound, maxval=bound)
    bias = jnp.zeros((FILM_OUT,), dtype=jnp.float32)

    out = cbda_forward(x_cond, x_to_film, weight_t, bias)
    out = jax.block_until_ready(out)

    ref = cbda_reference(x_cond, x_to_film, weight_t, bias)
    assert out.shape == (B, SEQ, SEQ), out.shape
    assert jnp.allclose(out, ref, atol=1e-4, rtol=1e-4), "mismatch vs reference"

    print("KERNEL_OK")
</pallas_src>

<mosaic_0001>
module attributes {stable_mosaic.version = 11 : i64} {
  func.func @cbda_kernel(%arg0: i32, %arg1: memref<2x1x86xf32, #tpu.memory_space<vmem>>, %arg2: memref<2x1x86xf32, #tpu.memory_space<vmem>>, %arg3: memref<2x256x86xf32, #tpu.memory_space<vmem>>, %arg4: memref<86x256xf32, #tpu.memory_space<vmem>>, %arg5: memref<256x256xf32, #tpu.memory_space<vmem>>, %arg6: memref<2x256x256xf32, #tpu.memory_space<vmem>>) attributes {dimension_semantics = [#tpu.dimension_semantics<parallel>], iteration_bounds = array<i64: 1>, scalar_prefetch = 0 : i64, scratch_operands = 0 : i64, tpu.core_type = #tpu.core_type<tc>, window_params = [{transform_indices = @transform_0, window_bounds = array<i64: 2, 1, 86>}, {transform_indices = @transform_1, window_bounds = array<i64: 2, 1, 86>}, {transform_indices = @transform_2, window_bounds = array<i64: 2, 256, 86>}, {pipeline_mode = #tpu.pipeline_mode<synchronous>, transform_indices = @transform_3, window_bounds = array<i64: 86, 256>}, {pipeline_mode = #tpu.pipeline_mode<synchronous>, transform_indices = @transform_4, window_bounds = array<i64: 256, 256>}, {transform_indices = @transform_5, window_bounds = array<i64: 2, 256, 256>}]} {
    %c0 = arith.constant 0 : index
    %c0_0 = arith.constant 0 : index
    %c0_1 = arith.constant 0 : index
    %0 = vector.load %arg1[%c0, %c0_0, %c0_1] : memref<2x1x86xf32, #tpu.memory_space<vmem>>, vector<2x1x86xf32>
    %c0_2 = arith.constant 0 : index
    %c0_3 = arith.constant 0 : index
    %c0_4 = arith.constant 0 : index
    %1 = vector.load %arg3[%c0_2, %c0_3, %c0_4] : memref<2x256x86xf32, #tpu.memory_space<vmem>>, vector<2x256x86xf32>
    %2 = vector.broadcast %0 : vector<2x1x86xf32> to vector<2x256x86xf32>
    %3 = arith.mulf %2, %1 : vector<2x256x86xf32>
    %c0_5 = arith.constant 0 : index
    %c0_6 = arith.constant 0 : index
    %c0_7 = arith.constant 0 : index
    %4 = vector.load %arg2[%c0_5, %c0_6, %c0_7] : memref<2x1x86xf32, #tpu.memory_space<vmem>>, vector<2x1x86xf32>
    %5 = vector.broadcast %4 : vector<2x1x86xf32> to vector<2x256x86xf32>
    %6 = arith.addf %3, %5 : vector<2x256x86xf32>
    %7 = vector.shape_cast %6 : vector<2x256x86xf32> to vector<512x86xf32>
    %c0_8 = arith.constant 0 : index
    %c0_9 = arith.constant 0 : index
    %8 = vector.load %arg4[%c0_8, %c0_9] : memref<86x256xf32, #tpu.memory_space<vmem>>, vector<86x256xf32>
    %cst = arith.constant dense<0.000000e+00> : vector<512x256xf32>
    %9 = tpu.matmul %7, %8, %cst {dimension_numbers = #tpu.dot_dimension_numbers<[1], [0], [0], [1], [0, 0, 1, 1], [], []>} : vector<512x86xf32>, vector<86x256xf32>, vector<512x256xf32> -> vector<512x256xf32>
    %10 = vector.shape_cast %9 : vector<512x256xf32> to vector<2x256x256xf32>
    %c0_10 = arith.constant 0 : index
    %c0_11 = arith.constant 0 : index
    %11 = vector.load %arg5[%c0_10, %c0_11] : memref<256x256xf32, #tpu.memory_space<vmem>>, vector<256x256xf32>
    %12 = vector.shape_cast %11 : vector<256x256xf32> to vector<1x256x256xf32>
    %13 = vector.broadcast %12 : vector<1x256x256xf32> to vector<2x256x256xf32>
    %14 = arith.mulf %10, %13 : vector<2x256x256xf32>
    %c0_12 = arith.constant 0 : index
    %c0_13 = arith.constant 0 : index
    %c0_14 = arith.constant 0 : index
    %15 = vector.load %arg6[%c0_12, %c0_13, %c0_14] : memref<2x256x256xf32, #tpu.memory_space<vmem>>, vector<2x256x256xf32>
    tpu.vector_store %arg6[%c0_12, %c0_13, %c0_14], %14 {strides = array<i32>} : memref<2x256x256xf32, #tpu.memory_space<vmem>>, vector<2x256x256xf32>,
    return
  }
  func.func @transform_0(%arg0: i32) -> (i32, i32, i32) {
    %c0_i32 = arith.constant 0 : i32
    %c0_i32_0 = arith.constant 0 : i32
    %c0_i32_1 = arith.constant 0 : i32
    return %arg0, %c0_i32, %c0_i32_0 : i32, i32, i32
  }
  func.func @transform_1(%arg0: i32) -> (i32, i32, i32) {
    %c0_i32 = arith.constant 0 : i32
    %c0_i32_0 = arith.constant 0 : i32
    %c0_i32_1 = arith.constant 0 : i32
    return %arg0, %c0_i32, %c0_i32_0 : i32, i32, i32
  }
  func.func @transform_2(%arg0: i32) -> (i32, i32, i32) {
    %c0_i32 = arith.constant 0 : i32
    %c0_i32_0 = arith.constant 0 : i32
    %c0_i32_1 = arith.constant 0 : i32
    return %arg0, %c0_i32, %c0_i32_0 : i32, i32, i32
  }
  func.func @transform_3(%arg0: i32) -> (i32, i32) {
    %c0_i32 = arith.constant 0 : i32
    %c0_i32_0 = arith.constant 0 : i32
    %c0_i32_1 = arith.constant 0 : i32
    return %c0_i32, %c0_i32_0 : i32, i32
  }
  func.func @transform_4(%arg0: i32) -> (i32, i32) {
    %c0_i32 = arith.constant 0 : i32
    %c0_i32_0 = arith.constant 0 : i32
    %c0_i32_1 = arith.constant 0 : i32
    return %c0_i32, %c0_i32_0 : i32, i32
  }
  func.func @transform_5(%arg0: i32) -> (i32, i32, i32) {
    %c0_i32 = arith.constant 0 : i32
    %c0_i32_0 = arith.constant 0 : i32
    %c0_i32_1 = arith.constant 0 : i32
    return %arg0, %c0_i32, %c0_i32_0 : i32, i32, i32
  }
}

</mosaic_0001>

<bundles_post_ra>
// kernel: tpu_custom_call.1
= control target key start
LH: loop header
LB: loop body
LE: loop exit
PB: predicated region body
PF: predicated region fallthrough
CT: control target
= control target key end

     0   :  { %vm456_vm0 = vcmask 1045504   ;;  %vm263_vm1 = vcmask 703488   ;;  %v1366_v51 = vmov 0.0   ;;  %s2249_s0 = inlined_call_operand.vmem [shape: f32[2,1,86], index: 0, kind: input, shape index: {}]   ;;  %s2250_s1 = inlined_call_operand.vmem [shape: f32[2,1,86], index: 1, kind: input, shape index: {}]   ;;  %s2251_s2 = inlined_call_operand.vmem [shape: f32[2,256,86], index: 2, kind: input, shape index: {}]   ;;  %s2252_s3 = inlined_call_operand.vmem [shape: f32[86,256], index: 3, kind: input, shape index: {}]   ;;  %s2253_s4 = inlined_call_operand.vmem [shape: f32[256,256], index: 4, kind: input, shape index: {}]   ;;  %s2254_s5 = inlined_call_operand.hbm [shape: f32[2,256,256], index: 5, kind: output, shape index: {}]  }
   0x1   :  { %v262_v0 = vld [vmem:[%s2252_s3 + $0xa8] sm:$0x3f]  ;;  %v261_v1 = vld [vmem:[%s2252_s3 + $0xa0] sm:$0x3f]  ;;  %v260_v2 = vld [vmem:[%s2252_s3 + $0x98] sm:$0xff]  ;;  %527 = vmatprep.mubr.f32.mxu0 %v1366_v51  ;;  %719 = vmatprep.mubr.f32.mxu1 %v1366_v51 }
   0x2   :  { %1252 = vmatprep.subr.msk.mxu0 %vm456_vm0, %v262_v0  ;;  %1318 = vmatprep.subr.msk.mxu1 %vm456_vm0, %v262_v0  ;;  %v259_v3 = vld [vmem:[%s2252_s3 + $0x90] sm:$0xff]  ;;  %v258_v4 = vld [vmem:[%s2252_s3 + $0x88] sm:$0xff]  ;;  %v257_v5 = vld [vmem:[%s2252_s3 + $0x80] sm:$0xff] }
   0x3   :  { %1253 = vmatpush1.msk.msra.mxu0 %vm456_vm0, %v261_v1  ;;  %1329 = vmatpush1.msk.msra.mxu1 %vm456_vm0, %v261_v1  ;;  %v256_v6 = vld [vmem:[%s2252_s3 + $0x78] sm:$0xff]  ;;  %v255_v7 = vld [vmem:[%s2252_s3 + $0x70] sm:$0xff]  ;;  %v254_v8 = vld [vmem:[%s2252_s3 + $0x68] sm:$0xff] }
   0x4   :  { %475 = vmatprep.subr.mxu0 %v260_v2  ;;  %1319 = vmatprep.subr.mxu1 %v260_v2  ;;  %v253_v9 = vld [vmem:[%s2252_s3 + $0x60] sm:$0xff]  ;;  %v252_v10 = vld [vmem:[%s2252_s3 + $0x58] sm:$0xff]  ;;  %v251_v11 = vld [vmem:[%s2252_s3 + $0x50] sm:$0xff] }
   0x5   :  { %476 = vmatpush1.msra.mxu0 %v259_v3  ;;  %1330 = vmatpush1.msra.mxu1 %v259_v3  ;;  %v250_v12 = vld [vmem:[%s2252_s3 + $0x48] sm:$0xff]  ;;  %v249_v13 = vld [vmem:[%s2252_s3 + $0x40] sm:$0xff]  ;;  %v248_v14 = vld [vmem:[%s2252_s3 + $0x38] sm:$0xff] }
   0x6   :  { %477 = vmatprep.subr.mxu0 %v258_v4  ;;  %1320 = vmatprep.subr.mxu1 %v258_v4  ;;  %v247_v15 = vld [vmem:[%s2252_s3 + $0x30] sm:$0xff]  ;;  %v1451_v16 = vld [vmem:[%s2249_s0] ss:$0 sm:$0xff]  ;;  %v1459_v18 = vld [vmem:[%s2249_s0 + $0x1] ss:$0 sm:$0xff] }
   0x7   :  { %478 = vmatpush1.msra.mxu0 %v257_v5  ;;  %1331 = vmatpush1.msra.mxu1 %v257_v5  ;;  %v23_v17 = vld [vmem:[%s2251_s2] sm:$0xff]  ;;  %v246_v20 = vld [vmem:[%s2252_s3 + $0x28] sm:$0xff]  ;;  %v244_v24 = vld [vmem:[%s2252_s3 + $0x18] sm:$0xff] }
   0x8   :  { %479 = vmatprep.subr.mxu0 %v256_v6  ;;  %1321 = vmatprep.subr.mxu1 %v256_v6  ;;  %v55_v19 = vld [vmem:[%s2251_s2 + $0x100] sm:$0xff]  ;;  %v24_v22 = vld [vmem:[%s2251_s2 + $0x8] sm:$0xff]  ;;  %v99_v25 = vmul.f32 %v1451_v16, %v23_v17  ;;  %v243_v27 = vld [vmem:[%s2252_s3 + $0x10] sm:$0xff] }
   0x9   :  { %480 = vmatpush1.msra.mxu0 %v255_v7  ;;  %1332 = vmatpush1.msra.mxu1 %v255_v7  ;;  %v245_v21 = vld [vmem:[%s2252_s3 + $0x20] sm:$0xff]  ;;  %v56_v23 = vld [vmem:[%s2251_s2 + $0x108] sm:$0xff]  ;;  %v131_v26 = vmul.f32 %v1459_v18, %v55_v19  ;;  %v100_v31 = vmul.f32 %v1451_v16, %v24_v22  ;;  %v25_v33 = vld [vmem:[%s2251_s2 + $0x10] sm:$0xff] }
   0xa   :  { %481 = vmatprep.subr.mxu0 %v254_v8  ;;  %1322 = vmatprep.subr.mxu1 %v254_v8  ;;  %v1487_v28 = vld [vmem:[%s2250_s1] ss:$0 sm:$0xff]  ;;  %v1492_v29 = vld [vmem:[%s2250_s1 + $0x1] ss:$0 sm:$0xff]  ;;  %v242_v30 = vld [vmem:[%s2252_s3 + $0x8] sm:$0xff]  ;;  %v132_v32 = vmul.f32 %v1459_v18, %v56_v23  ;;  %v101_v42 = vmul.f32 %v1451_v16, %v25_v33 }
   0xb   :  { %482 = vmatpush1.msra.mxu0 %v253_v9  ;;  %1333 = vmatpush1.msra.mxu1 %v253_v9  ;;  %v57_v34 = vld [vmem:[%s2251_s2 + $0x110] sm:$0xff]  ;;  %v241_v35 = vld [vmem:[%s2252_s3] sm:$0xff]  ;;  %v26_v36 = vld [vmem:[%s2251_s2 + $0x18] sm:$0xff]  ;;  %v177_v37 = vadd.f32 %v1487_v28, %v99_v25  ;;  %v209_v38 = vadd.f32 %v1492_v29, %v131_v26  ;;  %v178_v47 = vadd.f32 %v1487_v28, %v100_v31 }
   0xc   :  { %483 = vmatprep.subr.mxu0 %v252_v10  ;;  %1323 = vmatprep.subr.mxu1 %v252_v10  ;;  %v58_v39 = vld [vmem:[%s2251_s2 + $0x118] sm:$0xff]  ;;  %v27_v40 = vld [vmem:[%s2251_s2 + $0x20] sm:$0xff]  ;;  %v133_v43 = vmul.f32 %v1459_v18, %v57_v34  ;;  %v28_v44 = vld [vmem:[%s2251_s2 + $0x28] sm:$0xff]  ;;  %v210_v48 = vadd.f32 %v1492_v29, %v132_v32  ;;  %v102_v49 = vmul.f32 %v1451_v16, %v26_v36 }
   0xd   :  { %484 = vmatpush1.msra.mxu0 %v251_v11  ;;  %1334 = vmatpush1.msra.mxu1 %v251_v11  ;;  %v59_v41 = vld [vmem:[%s2251_s2 + $0x120] sm:$0xff]  ;;  %v60_v45 = vld [vmem:[%s2251_s2 + $0x128] sm:$0xff]  ;;  %v29_v46 = vld [vmem:[%s2251_s2 + $0x30] sm:$0xff]  ;;  %v134_v52 = vmul.f32 %v1459_v18, %v58_v39  ;;  %v103_v53 = vmul.f32 %v1451_v16, %v27_v40  ;;  %v104_v55 = vmul.f32 %v1451_v16, %v28_v44 }
   0xe   :  { %485 = vmatprep.subr.mxu0 %v250_v12  ;;  %1324 = vmatprep.subr.mxu1 %v250_v12  ;;  %v61_v50 = vld [vmem:[%s2251_s2 + $0x130] sm:$0xff]  ;;  %v135_v54 = vmul.f32 %v1459_v18, %v59_v41  ;;  %v136_v56 = vmul.f32 %v1459_v18, %v60_v45  ;;  %v105_v57 = vmul.f32 %v1451_v16, %v29_v46  ;;  %v30_v59 = vld [vmem:[%s2251_s2 + $0x38] sm:$0xff]  ;;  %v39_v63 = vld [vmem:[%s2251_s2 + $0x80] sm:$0xff] }
   0xf   :  { %486 = vmatpush1.msra.mxu0 %v249_v13  ;;  %1335 = vmatpush1.msra.mxu1 %v249_v13  ;;  %v137_v58 = vmul.f32 %v1459_v18, %v61_v50  ;;  %v179_v60 = vadd.f32 %v1487_v28, %v101_v42  ;;  %v211_v61 = vadd.f32 %v1492_v29, %v133_v43  ;;  %v62_v62 = vld [vmem:[%s2251_s2 + $0x138] sm:$0xff]  ;;  %v71_v0 = vld [vmem:[%s2251_s2 + $0x180] sm:$0xff]  ;;  %v40_v5 = vld [vmem:[%s2251_s2 + $0x88] sm:$0xff] }
  0x10   :  { %487 = vmatprep.subr.mxu0 %v248_v14  ;;  %1325 = vmatprep.subr.mxu1 %v248_v14  ;;  %v180_v1 = vadd.f32 %v1487_v28, %v102_v49  ;;  %v212_v2 = vadd.f32 %v1492_v29, %v134_v52  ;;  %v1569_v3 = vadd.f32 %v1487_v28, %v103_v53  ;;  %v72_v6 = vld [vmem:[%s2251_s2 + $0x188] sm:$0xff]  ;;  %v41_v7 = vld [vmem:[%s2251_s2 + $0x90] sm:$0xff]  ;;  %v42_v12 = vld [vmem:[%s2251_s2 + $0x98] sm:$0xff] }
  0x11   :  { %488 = vmatpush1.msra.mxu0 %v247_v15  ;;  %1336 = vmatpush1.msra.mxu1 %v247_v15  ;;  %v1572_v4 = vadd.f32 %v1492_v29, %v135_v54  ;;  %v1586_v8 = vadd.f32 %v1487_v28, %v104_v55  ;;  %v1589_v9 = vadd.f32 %v1492_v29, %v136_v56  ;;  %v73_v11 = vld [vmem:[%s2251_s2 + $0x190] sm:$0xff]  ;;  %v74_v13 = vld [vmem:[%s2251_s2 + $0x198] sm:$0xff] }
  0x12   :  { %489 = vmatprep.subr.mxu0 %v246_v20  ;;  %1326 = vmatprep.subr.mxu1 %v246_v20  ;;  %v1592_v10 = vadd.f32 %v1487_v28, %v105_v57  ;;  %v1606_v14 = vadd.f32 %v1492_v29, %v137_v58  ;;  %v1609_v15 = vmul.f32 %v1451_v16, %v30_v59 }
  0x13   :  { %490 = vmatpush1.msra.mxu0 %v245_v21  ;;  %1337 = vmatpush1.msra.mxu1 %v245_v21  ;;  %v1612_v17 = vmul.f32 %v1459_v18, %v62_v62  ;;  %v115_v19 = vmul.f32 %v1451_v16, %v39_v63  ;;  %v147_v20 = vmul.f32 %v1459_v18, %v71_v0 }
  0x14   :  { %491 = vmatprep.subr.mxu0 %v244_v24  ;;  %1327 = vmatprep.subr.mxu1 %v244_v24  ;;  %v116_v21 = vmul.f32 %v1451_v16, %v40_v5  ;;  %v148_v22 = vmul.f32 %v1459_v18, %v72_v6 }
  0x15   :  { %492 = vmatpush1.msra.mxu0 %v243_v27  ;;  %1338 = vmatpush1.msra.mxu1 %v243_v27 }
  0x16   :  { %493 = vmatprep.subr.mxu0 %v242_v30  ;;  %1328 = vmatprep.subr.mxu1 %v242_v30 }
  0x17   :  { %494 = vmatpush1.msra.mxu0 %v241_v35  ;;  %1339 = vmatpush1.msra.mxu1 %v241_v35 }
  0x18   :  { %1254 = vmatmul.mubr.msk.f32.vlgmr.msra.gmra.mxu0 %vm263_vm1, %v177_v37  ;;  %1286 = vmatmul.mubr.msk.f32.vlgmr.msra.gmra.mxu1 %vm263_vm1, %v209_v38 }
  0x19   :  { %533 = vmatprep.mubr.f32.mxu0 %v1366_v51  ;;  %725 = vmatprep.mubr.f32.mxu1 %v1366_v51 }
  0x1c   :  { %1255 = vmatmul.mubr.msk.f32.gmra.mxu0 %vm263_vm1, %v178_v47  ;;  %1287 = vmatmul.mubr.msk.f32.gmra.mxu1 %vm263_vm1, %v210_v48 }
  0x1d   :  { %539 = vmatprep.mubr.f32.mxu0 %v1366_v51  ;;  %731 = vmatprep.mubr.f32.mxu1 %v1366_v51 }
  0x1e   :  { %10 = vsyncpa [#allocation3], 0  ;;  %v117_v23 = vmul.f32 %v1451_v16, %v41_v7  ;;  %v149_v24 = vmul.f32 %v1459_v18, %v73_v11  ;;  %v118_v25 = vmul.f32 %v1451_v16, %v42_v12  ;;  %v150_v26 = vmul.f32 %v1459_v18, %v74_v13  ;;  %v43_v27 = vld [vmem:[%s2251_s2 + $0xa0] sm:$0xff]  ;;  %v44_v31 = vld [vmem:[%s2251_s2 + $0xa8] sm:$0xff]  ;;  %s1367_s16 = smov [#allocation2]  }
  0x1f   :  { %v75_v30 = vld [vmem:[%s2251_s2 + $0x1a0] sm:$0xff]  ;;  %v1634_v32 = vadd.f32 %v1487_v28, %v115_v19  ;;  %v1637_v33 = vadd.f32 %v1492_v29, %v147_v20  ;;  %v1640_v34 = vadd.f32 %v1487_v28, %v116_v21  ;;  %v76_v35 = vld [vmem:[%s2251_s2 + $0x1a8] sm:$0xff]  ;;  %v45_v36 = vld [vmem:[%s2251_s2 + $0xb0] sm:$0xff]  ;;  %v1654_v38 = vadd.f32 %v1492_v29, %v148_v22  ;;  %s1237_s17 = sshll.u32 %s1367_s16, 4  ;;  %s1238_s17 = int_to_ptr.vmem [resolvable:$true] %s1237_s17 }
  0x20   :  { %1256 = vmatmul.mubr.msk.f32.gmra.mxu0 %vm263_vm1, %v179_v60  ;;  %1288 = vmatmul.mubr.msk.f32.gmra.mxu1 %vm263_vm1, %v211_v61  ;;  %v77_v37 = vld [vmem:[%s2251_s2 + $0x1b0] sm:$0xff]  ;;  %v1657_v39 = vadd.f32 %v1487_v28, %v117_v23  ;;  %v1660_v40 = vadd.f32 %v1492_v29, %v149_v24  ;;  %v46_v41 = vld [vmem:[%s2251_s2 + $0xb8] sm:$0xff]  ;;  %v1666_v42 = vadd.f32 %v1487_v28, %v118_v25  ;;  %v47_v52 = vld [vmem:[%s2251_s2 + $0xc0] sm:$0xff]  ;;  %s1344_s20 = scalar_lea.vmem %s1238_s17, 16384  ;;  %p1349_p1 = scmp.lt.s32.totalorder %s1238_s17, %s1238_s17 }
  0x21   :  { %545 = vmatprep.mubr.f32.mxu0 %v1366_v51  ;;  %737 = vmatprep.mubr.f32.mxu1 %v1366_v51  ;;  %v1669_v43 = vadd.f32 %v1492_v29, %v150_v26  ;;  %v119_v44 = vmul.f32 %v1451_v16, %v43_v27  ;;  %v151_v45 = vmul.f32 %v1459_v18, %v75_v30  ;;  %v78_v50 = vld [vmem:[%s2251_s2 + $0x1b8] sm:$0xff]  ;;  %v79_v53 = vld [vmem:[%s2251_s2 + $0x1c0] sm:$0xff]  ;;  %v48_v57 = vld [vmem:[%s2251_s2 + $0xc8] sm:$0xff]  ;;  %p1345_p0 = scmp.ne.s32.totalorder %s1238_s17, %s1344_s20  ;;  %p1350_p2 = scmp.lt.s32.totalorder %s1344_s20, %s1344_s20 }
  0x22   :  { %v120_v46 = vmul.f32 %v1451_v16, %v44_v31  ;;  %v152_v47 = vmul.f32 %v1459_v18, %v76_v35  ;;  %v121_v48 = vmul.f32 %v1451_v16, %v45_v36  ;;  %v153_v49 = vmul.f32 %v1459_v18, %v77_v37  ;;  %v80_v58 = vld [vmem:[%s2251_s2 + $0x1c8] sm:$0xff]  ;;  %v49_v59 = vld [vmem:[%s2251_s2 + $0xd0] sm:$0xff]  ;;  %v50_v13 = vld [vmem:[%s2251_s2 + $0xd8] sm:$0xff] }
  0x23   :  { %v1689_v54 = vadd.f32 %v1487_v28, %v119_v44  ;;  %v1692_v55 = vadd.f32 %v1492_v29, %v151_v45  ;;  %v122_v56 = vmul.f32 %v1451_v16, %v46_v41  ;;  %v81_v63 = vld [vmem:[%s2251_s2 + $0x1d0] sm:$0xff]  ;;  %v123_v5 = vmul.f32 %v1451_v16, %v47_v52  ;;  %v82_v19 = vld [vmem:[%s2251_s2 + $0x1d8] sm:$0xff]  ;;  %v51_v20 = vld [vmem:[%s2251_s2 + $0xe0] sm:$0xff]  ;;  %p1351_p3 = por %p1350_p2, %p1349_p1 }
  0x24   :  { %1257 = vmatmul.mubr.msk.f32.gmra.mxu0 %vm263_vm1, %v180_v1  ;;  %1289 = vmatmul.mubr.msk.f32.gmra.mxu1 %vm263_vm1, %v212_v2  ;;  %v1707_v60 = vadd.f32 %v1487_v28, %v120_v46  ;;  %v1710_v61 = vadd.f32 %v1492_v29, %v152_v47  ;;  %v1713_v62 = vadd.f32 %v1487_v28, %v121_v48  ;;  %v83_v24 = vld [vmem:[%s2251_s2 + $0x1e0] sm:$0xff]  ;;  %v52_v25 = vld [vmem:[%s2251_s2 + $0xe8] sm:$0xff]  ;;  %v53_v30 = vld [vmem:[%s2251_s2 + $0xf0] sm:$0xff] }
  0x25   :  { %551 = vmatprep.mubr.f32.mxu0 %v1366_v51  ;;  %743 = vmatprep.mubr.f32.mxu1 %v1366_v51  ;;  %v1719_v0 = vadd.f32 %v1492_v29, %v153_v49  ;;  %v1722_v1 = vadd.f32 %v1487_v28, %v122_v56  ;;  %v154_v2 = vmul.f32 %v1459_v18, %v78_v50  ;;  %v85_v47 = vld [vmem:[%s2251_s2 + $0x1f0] sm:$0xff]  ;;  %v54_v48 = vld [vmem:[%s2251_s2 + $0xf8] sm:$0xff]  ;;  %v31_v49 = vld [vmem:[%s2251_s2 + $0x40] sm:$0xff]  ;;  %p1352_p4 = pnand %p1351_p3, %p1345_p0 }
  0x26   :  { %v155_v6 = vmul.f32 %v1459_v18, %v79_v53  ;;  %v124_v7 = vmul.f32 %v1451_v16, %v48_v57  ;;  %v156_v11 = vmul.f32 %v1459_v18, %v80_v58  ;;  %v125_v12 = vmul.f32 %v1451_v16, %v49_v59  ;;  %v63_v50 = vld [vmem:[%s2251_s2 + $0x140] sm:$0xff] }
  0x27   :  { %v1744_v21 = vadd.f32 %v1492_v29, %v154_v2  ;;  %v1747_v22 = vadd.f32 %v1487_v28, %v123_v5  ;;  %v157_v23 = vmul.f32 %v1459_v18, %v81_v63  ;;  %v126_v36 = vmul.f32 %v1451_v16, %v50_v13 }
  0x28   :  { %1258 = vmatmul.mubr.msk.f32.gmra.mxu0 %vm263_vm1, %v1569_v3  ;;  %1290 = vmatmul.mubr.msk.f32.gmra.mxu1 %vm263_vm1, %v1572_v4  ;;  %v84_v3 = vld [vmem:[%s2251_s2 + $0x1e8] sm:$0xff]  ;;  %v1762_v4 = vadd.f32 %v1492_v29, %v155_v6  ;;  %v1765_v26 = vadd.f32 %v1487_v28, %v124_v7  ;;  %v1768_v27 = vadd.f32 %v1492_v29, %v156_v11 }
  0x29   :  { %557 = vmatprep.mubr.f32.mxu0 %v1366_v51  ;;  %749 = vmatprep.mubr.f32.mxu1 %v1366_v51  ;;  %v1774_v31 = vadd.f32 %v1487_v28, %v125_v12  ;;  %v1777_v35 = vadd.f32 %v1492_v29, %v157_v23  ;;  %v158_v37 = vmul.f32 %v1459_v18, %v82_v19  ;;  %v32_v19 = vld [vmem:[%s2251_s2 + $0x48] sm:$0xff] }
  0x2a   :  { %v127_v41 = vmul.f32 %v1451_v16, %v51_v20  ;;  %v159_v44 = vmul.f32 %v1459_v18, %v83_v24  ;;  %v128_v45 = vmul.f32 %v1451_v16, %v52_v25  ;;  %v160_v46 = vmul.f32 %v1459_v18, %v84_v3  ;;  %v33_v3 = vld [vmem:[%s2251_s2 + $0x50] sm:$0xff] }
  0x2b   :  { %v1802_v52 = vadd.f32 %v1487_v28, %v126_v36  ;;  %v1805_v53 = vadd.f32 %v1492_v29, %v158_v37  ;;  %v129_v56 = vmul.f32 %v1451_v16, %v53_v30  ;;  %v161_v2 = vmul.f32 %v1459_v18, %v85_v47  ;;  %v65_v30 = vld [vmem:[%s2251_s2 + $0x150] sm:$0xff] }
  0x2c   :  { %1259 = vmatmul.mubr.msk.f32.gmra.mxu0 %vm263_vm1, %v1586_v8  ;;  %1291 = vmatmul.mubr.msk.f32.gmra.mxu1 %vm263_vm1, %v1589_v9  ;;  %v86_v8 = vld [vmem:[%s2251_s2 + $0x1f8] sm:$0xff]  ;;  %v1814_v9 = vadd.f32 %v1487_v28, %v127_v41  ;;  %v1817_v57 = vadd.f32 %v1492_v29, %v159_v44  ;;  %v1820_v58 = vadd.f32 %v1487_v28, %v128_v45 }
  0x2d   :  { %563 = vmatprep.mubr.f32.mxu0 %v1366_v51  ;;  %755 = vmatprep.mubr.f32.mxu1 %v1366_v51  ;;  %v1823_v59 = vadd.f32 %v1492_v29, %v160_v46  ;;  %v1826_v63 = vadd.f32 %v1487_v28, %v129_v56  ;;  %v130_v5 = vmul.f32 %v1451_v16, %v54_v48  ;;  %v34_v45 = vld [vmem:[%s2251_s2 + $0x58] sm:$0xff]  ;;  %v35_v56 = vld [vmem:[%s2251_s2 + $0x60] sm:$0xff] }
  0x2e   :  { %v184_v6 = vadd.f32 %v1487_v28, %v1609_v15  ;;  %v107_v7 = vmul.f32 %v1451_v16, %v31_v49  ;;  %v139_v11 = vmul.f32 %v1459_v18, %v63_v50  ;;  %v162_v12 = vmul.f32 %v1459_v18, %v86_v8  ;;  %v66_v46 = vld [vmem:[%s2251_s2 + $0x158] sm:$0xff]  ;;  %v67_v8 = vld [vmem:[%s2251_s2 + $0x160] sm:$0xff] }
  0x2f   :  { %v216_v13 = vadd.f32 %v1492_v29, %v1612_v17  ;;  %v1845_v15 = vadd.f32 %v1492_v29, %v161_v2  ;;  %v1848_v20 = vadd.f32 %v1487_v28, %v130_v5  ;;  %v108_v17 = vmul.f32 %v1451_v16, %v32_v19 }
  0x30   :  { %1260 = vmatmul.mubr.msk.f32.gmra.mxu0 %vm263_vm1, %v1592_v10  ;;  %1292 = vmatmul.mubr.msk.f32.gmra.mxu1 %vm263_vm1, %v1606_v14  ;;  %v64_v10 = vld [vmem:[%s2251_s2 + $0x148] sm:$0xff]  ;;  %v1856_v14 = vadd.f32 %v1492_v29, %v162_v12  ;;  %v185_v23 = vadd.f32 %v1487_v28, %v107_v7  ;;  %v217_v24 = vadd.f32 %v1492_v29, %v139_v11 }
  0x31   :  { %569 = vmatprep.mubr.f32.mxu0 %v1366_v51  ;;  %761 = vmatprep.mubr.f32.mxu1 %v1366_v51  ;;  %v140_v25 = vmul.f32 %v1459_v18, %v64_v10  ;;  %v186_v36 = vadd.f32 %v1487_v28, %v108_v17  ;;  %v109_v41 = vmul.f32 %v1451_v16, %v33_v3  ;;  %v36_v11 = vld [vmem:[%s2251_s2 + $0x68] sm:$0xff] }
  0x32   :  { %v141_v44 = vmul.f32 %v1459_v18, %v65_v30  ;;  %v110_v47 = vmul.f32 %v1451_v16, %v34_v45  ;;  %v142_v50 = vmul.f32 %v1459_v18, %v66_v46  ;;  %v111_v2 = vmul.f32 %v1451_v16, %v35_v56  ;;  %v68_v12 = vld [vmem:[%s2251_s2 + $0x168] sm:$0xff]  ;;  %v920_v56 = vld [vmem:[%s2253_s4 + $0x40] sm:$0xff] }
  0x33   :  { %v218_v37 = vadd.f32 %v1492_v29, %v140_v25  ;;  %v187_v48 = vadd.f32 %v1487_v28, %v109_v41  ;;  %v143_v7 = vmul.f32 %v1459_v18, %v67_v8  ;;  %v112_v10 = vmul.f32 %v1451_v16, %v36_v11  ;;  %v70_v41 = vld [vmem:[%s2251_s2 + $0x178] sm:$0xff] }
  0x34   :  { %1261 = vmatmul.mubr.msk.f32.gmra.mxu0 %vm263_vm1, %v184_v6  ;;  %1293 = vmatmul.mubr.msk.f32.gmra.mxu1 %vm263_vm1, %v216_v13  ;;  %v219_v49 = vadd.f32 %v1492_v29, %v141_v44  ;;  %v188_v5 = vadd.f32 %v1487_v28, %v110_v47  ;;  %v220_v6 = vadd.f32 %v1492_v29, %v142_v50 }
  0x35   :  { %575 = vmatprep.mubr.f32.mxu0 %v1366_v51  ;;  %767 = vmatprep.mubr.f32.mxu1 %v1366_v51  ;;  %v189_v13 = vadd.f32 %v1487_v28, %v111_v2  ;;  %v221_v19 = vadd.f32 %v1492_v29, %v143_v7  ;;  %v144_v17 = vmul.f32 %v1459_v18, %v68_v12  ;;  %v921_v7 = vld [vmem:[%s2253_s4 + $0x48] sm:$0xff] }
  0x36   :  { %v190_v3 = vadd.f32 %v1487_v28, %v112_v10  ;;  %v146_v47 = vmul.f32 %v1459_v18, %v70_v41  ;;  %v922_v10 = vld [vmem:[%s2253_s4 + $0x50] sm:$0xff] }
  0x37   :  { %v222_v30 = vadd.f32 %v1492_v29, %v144_v17 }
  0x38   :  { %1262 = vmatmul.mubr.msk.f32.gmra.mxu0 %vm263_vm1, %v185_v23  ;;  %1294 = vmatmul.mubr.msk.f32.gmra.mxu1 %vm263_vm1, %v217_v24  ;;  %v37_v23 = vld [vmem:[%s2251_s2 + $0x70] sm:$0xff] }
  0x39   :  { %581 = vmatprep.mubr.f32.mxu0 %v1366_v51  ;;  %773 = vmatprep.mubr.f32.mxu1 %v1366_v51  ;;  %v69_v24 = vld [vmem:[%s2251_s2 + $0x170] sm:$0xff]  ;;  %v113_v25 = vmul.f32 %v1451_v16, %v37_v23 }
  0x3b   :  { %v191_v45 = vadd.f32 %v1487_v28, %v113_v25 }
  0x3c   :  { %1263 = vmatmul.mubr.msk.f32.gmra.mxu0 %vm263_vm1, %v186_v36  ;;  %1295 = vmatmul.mubr.msk.f32.gmra.mxu1 %vm263_vm1, %v218_v37  ;;  %v145_v36 = vmul.f32 %v1459_v18, %v69_v24  ;;  %v38_v37 = vld [vmem:[%s2251_s2 + $0x78] sm:$0xff]  ;;  %v912_v18 = vld [vmem:[%s2253_s4] sm:$0xff] }
  0x3d   :  { %587 = vmatprep.mubr.f32.mxu0 %v1366_v51  ;;  %779 = vmatprep.mubr.f32.mxu1 %v1366_v51  ;;  %v114_v44 = vmul.f32 %v1451_v16, %v38_v37 }
  0x3e   :  { %v223_v46 = vadd.f32 %v1492_v29, %v145_v36 }
  0x3f   :  { %v192_v16 = vadd.f32 %v1487_v28, %v114_v44  ;;  %v924_v44 = vld [vmem:[%s2253_s4 + $0x60] sm:$0xff] }
  0x40   :  { %1264 = vmatmul.mubr.msk.f32.gmra.mxu0 %vm263_vm1, %v187_v48  ;;  %1296 = vmatmul.mubr.msk.f32.gmra.mxu1 %vm263_vm1, %v219_v49  ;;  %v224_v48 = vadd.f32 %v1492_v29, %v146_v47 }
  0x41   :  { %593 = vmatprep.mubr.f32.mxu0 %v1366_v51  ;;  %785 = vmatprep.mubr.f32.mxu1 %v1366_v51 }
  0x44   :  { %1265 = vmatmul.mubr.msk.f32.gmra.mxu0 %vm263_vm1, %v188_v5  ;;  %1297 = vmatmul.mubr.msk.f32.gmra.mxu1 %vm263_vm1, %v220_v6 }
  0x45   :  { %599 = vmatprep.mubr.f32.mxu0 %v1366_v51  ;;  %791 = vmatprep.mubr.f32.mxu1 %v1366_v51 }
  0x48   :  { %1266 = vmatmul.mubr.msk.f32.gmra.mxu0 %vm263_vm1, %v189_v13  ;;  %1298 = vmatmul.mubr.msk.f32.gmra.mxu1 %vm263_vm1, %v221_v19 }
  0x49   :  { %605 = vmatprep.mubr.f32.mxu0 %v1366_v51  ;;  %797 = vmatprep.mubr.f32.mxu1 %v1366_v51 }
  0x4c   :  { %1267 = vmatmul.mubr.msk.f32.gmra.mxu0 %vm263_vm1, %v190_v3  ;;  %1299 = vmatmul.mubr.msk.f32.gmra.mxu1 %vm263_vm1, %v222_v30  ;;  %v923_v3 = vld [vmem:[%s2253_s4 + $0x58] sm:$0xff] }
  0x4d   :  { %611 = vmatprep.mubr.f32.mxu0 %v1366_v51  ;;  %803 = vmatprep.mubr.f32.mxu1 %v1366_v51 }
  0x50   :  { %1268 = vmatmul.mubr.msk.f32.gmra.mxu0 %vm263_vm1, %v191_v45  ;;  %1300 = vmatmul.mubr.msk.f32.gmra.mxu1 %vm263_vm1, %v223_v46 }
  0x51   :  { %617 = vmatprep.mubr.f32.mxu0 %v1366_v51  ;;  %809 = vmatprep.mubr.f32.mxu1 %v1366_v51 }
  0x54   :  { %1269 = vmatmul.mubr.msk.f32.gmra.mxu0 %vm263_vm1, %v192_v16  ;;  %1301 = vmatmul.mubr.msk.f32.gmra.mxu1 %vm263_vm1, %v224_v48  ;;  %v925_v48 = vld [vmem:[%s2253_s4 + $0x68] sm:$0xff] }
  0x55   :  { %623 = vmatprep.mubr.f32.mxu0 %v1366_v51  ;;  %815 = vmatprep.mubr.f32.mxu1 %v1366_v51 }
  0x58   :  { %1270 = vmatmul.mubr.msk.f32.gmra.mxu0 %vm263_vm1, %v1634_v32  ;;  %1302 = vmatmul.mubr.msk.f32.gmra.mxu1 %vm263_vm1, %v1637_v33  ;;  %v913_v32 = vld [vmem:[%s2253_s4 + $0x8] sm:$0xff] }
  0x59   :  { %629 = vmatprep.mubr.f32.mxu0 %v1366_v51  ;;  %821 = vmatprep.mubr.f32.mxu1 %v1366_v51 }
  0x5c   :  { %1271 = vmatmul.mubr.msk.f32.gmra.mxu0 %vm263_vm1, %v1640_v34  ;;  %1303 = vmatmul.mubr.msk.f32.gmra.mxu1 %vm263_vm1, %v1654_v38 }
  0x5d   :  { %635 = vmatprep.mubr.f32.mxu0 %v1366_v51  ;;  %827 = vmatprep.mubr.f32.mxu1 %v1366_v51 }
  0x60   :  { %1272 = vmatmul.mubr.msk.f32.gmra.mxu0 %vm263_vm1, %v1657_v39  ;;  %1304 = vmatmul.mubr.msk.f32.gmra.mxu1 %vm263_vm1, %v1660_v40  ;;  %v914_v39 = vld [vmem:[%s2253_s4 + $0x10] sm:$0xff] }
  0x61   :  { %641 = vmatprep.mubr.f32.mxu0 %v1366_v51  ;;  %833 = vmatprep.mubr.f32.mxu1 %v1366_v51 }
  0x64   :  { %1273 = vmatmul.mubr.msk.f32.gmra.mxu0 %vm263_vm1, %v1666_v42  ;;  %1305 = vmatmul.mubr.msk.f32.gmra.mxu1 %vm263_vm1, %v1669_v43 }
  0x65   :  { %647 = vmatprep.mubr.f32.mxu0 %v1366_v51  ;;  %839 = vmatprep.mubr.f32.mxu1 %v1366_v51 }
  0x68   :  { %1274 = vmatmul.mubr.msk.f32.gmra.mxu0 %vm263_vm1, %v1689_v54  ;;  %1306 = vmatmul.mubr.msk.f32.gmra.mxu1 %vm263_vm1, %v1692_v55  ;;  %v915_v55 = vld [vmem:[%s2253_s4 + $0x18] sm:$0xff] }
  0x69   :  { %653 = vmatprep.mubr.f32.mxu0 %v1366_v51  ;;  %845 = vmatprep.mubr.f32.mxu1 %v1366_v51 }
  0x6c   :  { %1275 = vmatmul.mubr.msk.f32.gmra.mxu0 %vm263_vm1, %v1707_v60  ;;  %1307 = vmatmul.mubr.msk.f32.gmra.mxu1 %vm263_vm1, %v1710_v61 }
  0x6d   :  { %659 = vmatprep.mubr.f32.mxu0 %v1366_v51  ;;  %851 = vmatprep.mubr.f32.mxu1 %v1366_v51 }
  0x70   :  { %1276 = vmatmul.mubr.msk.f32.gmra.mxu0 %vm263_vm1, %v1713_v62  ;;  %1308 = vmatmul.mubr.msk.f32.gmra.mxu1 %vm263_vm1, %v1719_v0 }
  0x71   :  { %665 = vmatprep.mubr.f32.mxu0 %v1366_v51  ;;  %857 = vmatprep.mubr.f32.mxu1 %v1366_v51 }
  0x74   :  { %1277 = vmatmul.mubr.msk.f32.gmra.mxu0 %vm263_vm1, %v1722_v1  ;;  %1309 = vmatmul.mubr.msk.f32.gmra.mxu1 %vm263_vm1, %v1744_v21  ;;  %v916_v1 = vld [vmem:[%s2253_s4 + $0x20] sm:$0xff] }
  0x75   :  { %671 = vmatprep.mubr.f32.mxu0 %v1366_v51  ;;  %863 = vmatprep.mubr.f32.mxu1 %v1366_v51 }
  0x78   :  { %1278 = vmatmul.mubr.msk.f32.gmra.mxu0 %vm263_vm1, %v1747_v22  ;;  %1310 = vmatmul.mubr.msk.f32.gmra.mxu1 %vm263_vm1, %v1762_v4 }
  0x79   :  { %677 = vmatprep.mubr.f32.mxu0 %v1366_v51  ;;  %869 = vmatprep.mubr.f32.mxu1 %v1366_v51 }
  0x7c   :  { %1279 = vmatmul.mubr.msk.f32.gmra.mxu0 %vm263_vm1, %v1765_v26  ;;  %1311 = vmatmul.mubr.msk.f32.gmra.mxu1 %vm263_vm1, %v1768_v27  ;;  %v917_v27 = vld [vmem:[%s2253_s4 + $0x28] sm:$0xff] }
  0x7d   :  { %683 = vmatprep.mubr.f32.mxu0 %v1366_v51  ;;  %875 = vmatprep.mubr.f32.mxu1 %v1366_v51 }
  0x80   :  { %1280 = vmatmul.mubr.msk.f32.gmra.mxu0 %vm263_vm1, %v1774_v31  ;;  %1312 = vmatmul.mubr.msk.f32.gmra.mxu1 %vm263_vm1, %v1777_v35 }
  0x81   :  { %689 = vmatprep.mubr.f32.mxu0 %v1366_v51  ;;  %881 = vmatprep.mubr.f32.mxu1 %v1366_v51 }
  0x84   :  { %1281 = vmatmul.mubr.msk.f32.gmra.mxu0 %vm263_vm1, %v1802_v52  ;;  %1313 = vmatmul.mubr.msk.f32.gmra.mxu1 %vm263_vm1, %v1805_v53 }
  0x85   :  { %695 = vmatprep.mubr.f32.mxu0 %v1366_v51  ;;  %887 = vmatprep.mubr.f32.mxu1 %v1366_v51 }
  0x88   :  { %1282 = vmatmul.mubr.msk.f32.gmra.mxu0 %vm263_vm1, %v1814_v9  ;;  %1314 = vmatmul.mubr.msk.f32.gmra.mxu1 %vm263_vm1, %v1817_v57  ;;  %v918_v9 = vld [vmem:[%s2253_s4 + $0x30] sm:$0xff] }
  0x89   :  { %701 = vmatprep.mubr.f32.mxu0 %v1366_v51  ;;  %893 = vmatprep.mubr.f32.mxu1 %v1366_v51 }
  0x8c   :  { %1283 = vmatmul.mubr.msk.f32.gmra.mxu0 %vm263_vm1, %v1820_v58  ;;  %1315 = vmatmul.mubr.msk.f32.gmra.mxu1 %vm263_vm1, %v1823_v59 }
  0x8d   :  { %707 = vmatprep.mubr.f32.mxu0 %v1366_v51  ;;  %899 = vmatprep.mubr.f32.mxu1 %v1366_v51 }
  0x90   :  { %1284 = vmatmul.mubr.msk.f32.gmra.mxu0 %vm263_vm1, %v1826_v63  ;;  %1316 = vmatmul.mubr.msk.f32.gmra.mxu1 %vm263_vm1, %v1845_v15  ;;  %v919_v15 = vld [vmem:[%s2253_s4 + $0x38] sm:$0xff] }
  0x91   :  { %713 = vmatprep.mubr.f32.mxu0 %v1366_v51  ;;  %905 = vmatprep.mubr.f32.mxu1 %v1366_v51 }
  0x94   :  { %1285 = vmatmul.mubr.msk.f32.gmra.mxu0 %vm263_vm1, %v1848_v20  ;;  %1317 = vmatmul.mubr.msk.f32.gmra.mxu1 %vm263_vm1, %v1856_v14 }
  0xd8   :  { %v529_v28 = vpop.f32.mrf.mxu0  ;;  %v721_v29 = vpop.f32.mrf.mxu1 }
  0xd9   :  { %v976_v33 = vmul.f32 %v912_v18, %v529_v28  ;;  %v1040_v34 = vmul.f32 %v912_v18, %v721_v29 }
  0xda   :  { %v531_v38 = vpop.f32.mrf.mxu0  ;;  %v723_v51 = vpop.f32.mrf.mxu1 }
  0xdb   :  { %1104 = vst [vmem:[#allocation2] sm:$0xff] %v976_v33  ;;  %1168 = vst [vmem:[#allocation2 + $0x200] sm:$0xff] %v1040_v34  ;;  %v977_v40 = vmul.f32 %v913_v32, %v531_v38  ;;  %v1041_v42 = vmul.f32 %v913_v32, %v723_v51  ;;  %v926_v33 = vld [vmem:[%s2253_s4 + $0x70] sm:$0xff] }
  0xdc   :  { %v535_v43 = vpop.f32.mrf.mxu0  ;;  %v727_v54 = vpop.f32.mrf.mxu1 }
  0xdd   :  { %1105 = vst [vmem:[#allocation2 + $0x8] sm:$0xff] %v977_v40  ;;  %1169 = vst [vmem:[#allocation2 + $0x208] sm:$0xff] %v1041_v42  ;;  %v978_v60 = vmul.f32 %v914_v39, %v535_v43  ;;  %v1042_v61 = vmul.f32 %v914_v39, %v727_v54  ;;  %v927_v40 = vld [vmem:[%s2253_s4 + $0x78] sm:$0xff] }
  0xde   :  { %v537_v62 = vpop.f32.mrf.mxu0  ;;  %v729_v0 = vpop.f32.mrf.mxu1 }
  0xdf   :  { %1106 = vst [vmem:[#allocation2 + $0x10] sm:$0xff] %v978_v60  ;;  %1170 = vst [vmem:[#allocation2 + $0x210] sm:$0xff] %v1042_v61  ;;  %v979_v21 = vmul.f32 %v915_v55, %v537_v62  ;;  %v1043_v22 = vmul.f32 %v915_v55, %v729_v0  ;;  %v928_v60 = vld [vmem:[%s2253_s4 + $0x80] sm:$0xff] }
  0xe0   :  { %v541_v4 = vpop.f32.mrf.mxu0  ;;  %v733_v26 = vpop.f32.mrf.mxu1 }
  0xe1   :  { %1107 = vst [vmem:[#allocation2 + $0x18] sm:$0xff] %v979_v21  ;;  %1171 = vst [vmem:[#allocation2 + $0x218] sm:$0xff] %v1043_v22  ;;  %v980_v31 = vmul.f32 %v916_v1, %v541_v4  ;;  %v1044_v35 = vmul.f32 %v916_v1, %v733_v26  ;;  %v929_v21 = vld [vmem:[%s2253_s4 + $0x88] sm:$0xff] }
  0xe2   :  { %v543_v52 = vpop.f32.mrf.mxu0  ;;  %v735_v53 = vpop.f32.mrf.mxu1 }
  0xe3   :  { %1108 = vst [vmem:[#allocation2 + $0x20] sm:$0xff] %v980_v31  ;;  %1172 = vst [vmem:[#allocation2 + $0x220] sm:$0xff] %v1044_v35  ;;  %v981_v57 = vmul.f32 %v917_v27, %v543_v52  ;;  %v1045_v58 = vmul.f32 %v917_v27, %v735_v53  ;;  %v930_v31 = vld [vmem:[%s2253_s4 + $0x90] sm:$0xff] }
  0xe4   :  { %v547_v59 = vpop.f32.mrf.mxu0  ;;  %v739_v63 = vpop.f32.mrf.mxu1 }
  0xe5   :  { %1109 = vst [vmem:[#allocation2 + $0x28] sm:$0xff] %v981_v57  ;;  %1173 = vst [vmem:[#allocation2 + $0x228] sm:$0xff] %v1045_v58  ;;  %v982_v20 = vmul.f32 %v918_v9, %v547_v59  ;;  %v1046_v14 = vmul.f32 %v918_v9, %v739_v63  ;;  %v931_v57 = vld [vmem:[%s2253_s4 + $0x98] sm:$0xff] }
  0xe6   :  { %v549_v49 = vpop.f32.mrf.mxu0  ;;  %v741_v50 = vpop.f32.mrf.mxu1 }
  0xe7   :  { %1110 = vst [vmem:[#allocation2 + $0x30] sm:$0xff] %v982_v20  ;;  %1174 = vst [vmem:[#allocation2 + $0x230] sm:$0xff] %v1046_v14  ;;  %v983_v8 = vmul.f32 %v919_v15, %v549_v49  ;;  %v1047_v2 = vmul.f32 %v919_v15, %v741_v50  ;;  %v932_v20 = vld [vmem:[%s2253_s4 + $0xa0] sm:$0xff] }
  0xe8   :  { %v553_v5 = vpop.f32.mrf.mxu0  ;;  %v745_v6 = vpop.f32.mrf.mxu1 }
  0xe9   :  { %1111 = vst [vmem:[#allocation2 + $0x38] sm:$0xff] %v983_v8  ;;  %1175 = vst [vmem:[#allocation2 + $0x238] sm:$0xff] %v1047_v2  ;;  %v984_v11 = vmul.f32 %v920_v56, %v553_v5  ;;  %v1048_v12 = vmul.f32 %v920_v56, %v745_v6  ;;  %v933_v8 = vld [vmem:[%s2253_s4 + $0xa8] sm:$0xff] }
  0xea   :  { %v555_v13 = vpop.f32.mrf.mxu0  ;;  %v747_v19 = vpop.f32.mrf.mxu1 }
  0xeb   :  { %1112 = vst [vmem:[#allocation2 + $0x40] sm:$0xff] %v984_v11  ;;  %1176 = vst [vmem:[#allocation2 + $0x240] sm:$0xff] %v1048_v12  ;;  %v985_v17 = vmul.f32 %v921_v7, %v555_v13  ;;  %v1049_v23 = vmul.f32 %v921_v7, %v747_v19  ;;  %v934_v11 = vld [vmem:[%s2253_s4 + $0xb0] sm:$0xff] }
  0xec   :  { %v559_v24 = vpop.f32.mrf.mxu0  ;;  %v751_v25 = vpop.f32.mrf.mxu1 }
  0xed   :  { %1113 = vst [vmem:[#allocation2 + $0x48] sm:$0xff] %v985_v17  ;;  %1177 = vst [vmem:[#allocation2 + $0x248] sm:$0xff] %v1049_v23  ;;  %v986_v30 = vmul.f32 %v922_v10, %v559_v24  ;;  %v1050_v36 = vmul.f32 %v922_v10, %v751_v25  ;;  %v935_v17 = vld [vmem:[%s2253_s4 + $0xb8] sm:$0xff] }
  0xee   :  { %v561_v37 = vpop.f32.mrf.mxu0  ;;  %v753_v41 = vpop.f32.mrf.mxu1 }
  0xef   :  { %1114 = vst [vmem:[#allocation2 + $0x50] sm:$0xff] %v986_v30  ;;  %1178 = vst [vmem:[#allocation2 + $0x250] sm:$0xff] %v1050_v36  ;;  %v987_v45 = vmul.f32 %v923_v3, %v561_v37  ;;  %v1051_v46 = vmul.f32 %v923_v3, %v753_v41  ;;  %v936_v30 = vld [vmem:[%s2253_s4 + $0xc0] sm:$0xff] }
  0xf0   :  { %v565_v47 = vpop.f32.mrf.mxu0  ;;  %v757_v16 = vpop.f32.mrf.mxu1 }
  0xf1   :  { %1115 = vst [vmem:[#allocation2 + $0x58] sm:$0xff] %v987_v45  ;;  %1179 = vst [vmem:[#allocation2 + $0x258] sm:$0xff] %v1051_v46  ;;  %v988_v18 = vmul.f32 %v924_v44, %v565_v47  ;;  %v1052_v28 = vmul.f32 %v924_v44, %v757_v16  ;;  %v937_v45 = vld [vmem:[%s2253_s4 + $0xc8] sm:$0xff] }
  0xf2   :  { %v567_v29 = vpop.f32.mrf.mxu0  ;;  %v759_v32 = vpop.f32.mrf.mxu1 }
  0xf3   :  { %1116 = vst [vmem:[#allocation2 + $0x60] sm:$0xff] %v988_v18  ;;  %1180 = vst [vmem:[#allocation2 + $0x260] sm:$0xff] %v1052_v28  ;;  %v989_v34 = vmul.f32 %v925_v48, %v567_v29  ;;  %v1053_v38 = vmul.f32 %v925_v48, %v759_v32  ;;  %v938_v18 = vld [vmem:[%s2253_s4 + $0xd0] sm:$0xff] }
  0xf4   :  { %v571_v51 = vpop.f32.mrf.mxu0  ;;  %v763_v39 = vpop.f32.mrf.mxu1 }
  0xf5   :  { %1117 = vst [vmem:[#allocation2 + $0x68] sm:$0xff] %v989_v34  ;;  %1181 = vst [vmem:[#allocation2 + $0x268] sm:$0xff] %v1053_v38  ;;  %v990_v42 = vmul.f32 %v926_v33, %v571_v51  ;;  %v1054_v43 = vmul.f32 %v926_v33, %v763_v39  ;;  %v939_v34 = vld [vmem:[%s2253_s4 + $0xd8] sm:$0xff] }
  0xf6   :  { %v573_v54 = vpop.f32.mrf.mxu0  ;;  %v765_v55 = vpop.f32.mrf.mxu1 }
  0xf7   :  { %1118 = vst [vmem:[#allocation2 + $0x70] sm:$0xff] %v990_v42  ;;  %1182 = vst [vmem:[#allocation2 + $0x270] sm:$0xff] %v1054_v43  ;;  %v991_v61 = vmul.f32 %v927_v40, %v573_v54  ;;  %v1055_v62 = vmul.f32 %v927_v40, %v765_v55  ;;  %v940_v42 = vld [vmem:[%s2253_s4 + $0xe0] sm:$0xff] }
  0xf8   :  { %v577_v0 = vpop.f32.mrf.mxu0  ;;  %v769_v1 = vpop.f32.mrf.mxu1 }
  0xf9   :  { %1119 = vst [vmem:[#allocation2 + $0x78] sm:$0xff] %v991_v61  ;;  %1183 = vst [vmem:[#allocation2 + $0x278] sm:$0xff] %v1055_v62  ;;  %v992_v22 = vmul.f32 %v928_v60, %v577_v0  ;;  %v1056_v4 = vmul.f32 %v928_v60, %v769_v1  ;;  %v941_v61 = vld [vmem:[%s2253_s4 + $0xe8] sm:$0xff] }
  0xfa   :  { %v579_v26 = vpop.f32.mrf.mxu0  ;;  %v771_v27 = vpop.f32.mrf.mxu1 }
  0xfb   :  { %1120 = vst [vmem:[#allocation2 + $0x80] sm:$0xff] %v992_v22  ;;  %1184 = vst [vmem:[#allocation2 + $0x280] sm:$0xff] %v1056_v4  ;;  %v993_v35 = vmul.f32 %v929_v21, %v579_v26  ;;  %v1057_v52 = vmul.f32 %v929_v21, %v771_v27  ;;  %v942_v22 = vld [vmem:[%s2253_s4 + $0xf0] sm:$0xff] }
  0xfc   :  { %v583_v53 = vpop.f32.mrf.mxu0  ;;  %v775_v9 = vpop.f32.mrf.mxu1 }
  0xfd   :  { %1121 = vst [vmem:[#allocation2 + $0x88] sm:$0xff] %v993_v35  ;;  %1185 = vst [vmem:[#allocation2 + $0x288] sm:$0xff] %v1057_v52  ;;  %v994_v58 = vmul.f32 %v930_v31, %v583_v53  ;;  %v1058_v59 = vmul.f32 %v930_v31, %v775_v9  ;;  %v943_v35 = vld [vmem:[%s2253_s4 + $0xf8] sm:$0xff] }
  0xfe   :  { %v585_v63 = vpop.f32.mrf.mxu0  ;;  %v777_v15 = vpop.f32.mrf.mxu1 }
  0xff   :  { %1122 = vst [vmem:[#allocation2 + $0x90] sm:$0xff] %v994_v58  ;;  %1186 = vst [vmem:[#allocation2 + $0x290] sm:$0xff] %v1058_v59  ;;  %v995_v14 = vmul.f32 %v931_v57, %v585_v63  ;;  %v1059_v49 = vmul.f32 %v931_v57, %v777_v15  ;;  %v944_v58 = vld [vmem:[%s2253_s4 + $0x100] sm:$0xff] }
 0x100   :  { %v589_v50 = vpop.f32.mrf.mxu0  ;;  %v781_v56 = vpop.f32.mrf.mxu1 }
 0x101   :  { %1123 = vst [vmem:[#allocation2 + $0x98] sm:$0xff] %v995_v14  ;;  %1187 = vst [vmem:[#allocation2 + $0x298] sm:$0xff] %v1059_v49  ;;  %v996_v2 = vmul.f32 %v932_v20, %v589_v50  ;;  %v1060_v5 = vmul.f32 %v932_v20, %v781_v56  ;;  %v945_v14 = vld [vmem:[%s2253_s4 + $0x108] sm:$0xff] }
 0x102   :  { %v591_v6 = vpop.f32.mrf.mxu0  ;;  %v783_v7 = vpop.f32.mrf.mxu1 }
 0x103   :  { %1124 = vst [vmem:[#allocation2 + $0xa0] sm:$0xff] %v996_v2  ;;  %1188 = vst [vmem:[#allocation2 + $0x2a0] sm:$0xff] %v1060_v5  ;;  %v997_v12 = vmul.f32 %v933_v8, %v591_v6  ;;  %v1061_v13 = vmul.f32 %v933_v8, %v783_v7  ;;  %v946_v2 = vld [vmem:[%s2253_s4 + $0x110] sm:$0xff] }
 0x104   :  { %v595_v19 = vpop.f32.mrf.mxu0  ;;  %v787_v10 = vpop.f32.mrf.mxu1 }
 0x105   :  { %1125 = vst [vmem:[#allocation2 + $0xa8] sm:$0xff] %v997_v12  ;;  %1189 = vst [vmem:[#allocation2 + $0x2a8] sm:$0xff] %v1061_v13  ;;  %v998_v23 = vmul.f32 %v934_v11, %v595_v19  ;;  %v1062_v24 = vmul.f32 %v934_v11, %v787_v10  ;;  %v947_v12 = vld [vmem:[%s2253_s4 + $0x118] sm:$0xff] }
 0x106   :  { %v597_v25 = vpop.f32.mrf.mxu0  ;;  %v789_v3 = vpop.f32.mrf.mxu1 }
 0x107   :  { %1126 = vst [vmem:[#allocation2 + $0xb0] sm:$0xff] %v998_v23  ;;  %1190 = vst [vmem:[#allocation2 + $0x2b0] sm:$0xff] %v1062_v24  ;;  %v999_v36 = vmul.f32 %v935_v17, %v597_v25  ;;  %v1063_v37 = vmul.f32 %v935_v17, %v789_v3  ;;  %v948_v23 = vld [vmem:[%s2253_s4 + $0x120] sm:$0xff] }
 0x108   :  { %v601_v41 = vpop.f32.mrf.mxu0  ;;  %v793_v44 = vpop.f32.mrf.mxu1 }
 0x109   :  { %1127 = vst [vmem:[#allocation2 + $0xb8] sm:$0xff] %v999_v36  ;;  %1191 = vst [vmem:[#allocation2 + $0x2b8] sm:$0xff] %v1063_v37  ;;  %v1000_v46 = vmul.f32 %v936_v30, %v601_v41  ;;  %v1064_v47 = vmul.f32 %v936_v30, %v793_v44  ;;  %v949_v36 = vld [vmem:[%s2253_s4 + $0x128] sm:$0xff] }
 0x10a   :  { %v603_v16 = vpop.f32.mrf.mxu0  ;;  %v795_v48 = vpop.f32.mrf.mxu1 }
 0x10b   :  { %1128 = vst [vmem:[#allocation2 + $0xc0] sm:$0xff] %v1000_v46  ;;  %1192 = vst [vmem:[#allocation2 + $0x2c0] sm:$0xff] %v1064_v47  ;;  %v1001_v28 = vmul.f32 %v937_v45, %v603_v16  ;;  %v1065_v29 = vmul.f32 %v937_v45, %v795_v48  ;;  %v950_v46 = vld [vmem:[%s2253_s4 + $0x130] sm:$0xff] }
 0x10c   :  { %v607_v32 = vpop.f32.mrf.mxu0  ;;  %v799_v33 = vpop.f32.mrf.mxu1 }
 0x10d   :  { %1129 = vst [vmem:[#allocation2 + $0xc8] sm:$0xff] %v1001_v28  ;;  %1193 = vst [vmem:[#allocation2 + $0x2c8] sm:$0xff] %v1065_v29  ;;  %v1002_v38 = vmul.f32 %v938_v18, %v607_v32  ;;  %v1066_v51 = vmul.f32 %v938_v18, %v799_v33  ;;  %v951_v28 = vld [vmem:[%s2253_s4 + $0x138] sm:$0xff] }
 0x10e   :  { %v609_v39 = vpop.f32.mrf.mxu0  ;;  %v801_v40 = vpop.f32.mrf.mxu1 }
 0x10f   :  { %1130 = vst [vmem:[#allocation2 + $0xd0] sm:$0xff] %v1002_v38  ;;  %1194 = vst [vmem:[#allocation2 + $0x2d0] sm:$0xff] %v1066_v51  ;;  %v1003_v43 = vmul.f32 %v939_v34, %v609_v39  ;;  %v1067_v54 = vmul.f32 %v939_v34, %v801_v40  ;;  %v952_v38 = vld [vmem:[%s2253_s4 + $0x140] sm:$0xff] }
 0x110   :  { %v613_v55 = vpop.f32.mrf.mxu0  ;;  %v805_v60 = vpop.f32.mrf.mxu1 }
 0x111   :  { %1131 = vst [vmem:[#allocation2 + $0xd8] sm:$0xff] %v1003_v43  ;;  %1195 = vst [vmem:[#allocation2 + $0x2d8] sm:$0xff] %v1067_v54  ;;  %v1004_v62 = vmul.f32 %v940_v42, %v613_v55  ;;  %v1068_v0 = vmul.f32 %v940_v42, %v805_v60  ;;  %v953_v43 = vld [vmem:[%s2253_s4 + $0x148] sm:$0xff] }
 0x112   :  { %v615_v1 = vpop.f32.mrf.mxu0  ;;  %v807_v21 = vpop.f32.mrf.mxu1 }
 0x113   :  { %1132 = vst [vmem:[#allocation2 + $0xe0] sm:$0xff] %v1004_v62  ;;  %1196 = vst [vmem:[#allocation2 + $0x2e0] sm:$0xff] %v1068_v0  ;;  %v1005_v4 = vmul.f32 %v941_v61, %v615_v1  ;;  %v1069_v26 = vmul.f32 %v941_v61, %v807_v21  ;;  %v954_v62 = vld [vmem:[%s2253_s4 + $0x150] sm:$0xff] }
 0x114   :  { %v619_v27 = vpop.f32.mrf.mxu0  ;;  %v811_v31 = vpop.f32.mrf.mxu1 }
 0x115   :  { %1133 = vst [vmem:[#allocation2 + $0xe8] sm:$0xff] %v1005_v4  ;;  %1197 = vst [vmem:[#allocation2 + $0x2e8] sm:$0xff] %v1069_v26  ;;  %v1006_v52 = vmul.f32 %v942_v22, %v619_v27  ;;  %v1070_v53 = vmul.f32 %v942_v22, %v811_v31  ;;  %v955_v4 = vld [vmem:[%s2253_s4 + $0x158] sm:$0xff] }
 0x116   :  { %v621_v9 = vpop.f32.mrf.mxu0  ;;  %v813_v57 = vpop.f32.mrf.mxu1 }
 0x117   :  { %1134 = vst [vmem:[#allocation2 + $0xf0] sm:$0xff] %v1006_v52  ;;  %1198 = vst [vmem:[#allocation2 + $0x2f0] sm:$0xff] %v1070_v53  ;;  %v1007_v59 = vmul.f32 %v943_v35, %v621_v9  ;;  %v1071_v63 = vmul.f32 %v943_v35, %v813_v57  ;;  %v956_v52 = vld [vmem:[%s2253_s4 + $0x160] sm:$0xff] }
 0x118   :  { %v625_v15 = vpop.f32.mrf.mxu0  ;;  %v817_v20 = vpop.f32.mrf.mxu1 }
 0x119   :  { %1135 = vst [vmem:[#allocation2 + $0xf8] sm:$0xff] %v1007_v59  ;;  %1199 = vst [vmem:[#allocation2 + $0x2f8] sm:$0xff] %v1071_v63  ;;  %v1008_v49 = vmul.f32 %v944_v58, %v625_v15  ;;  %v1072_v50 = vmul.f32 %v944_v58, %v817_v20  ;;  %v957_v59 = vld [vmem:[%s2253_s4 + $0x168] sm:$0xff] }
 0x11a   :  { %v627_v56 = vpop.f32.mrf.mxu0  ;;  %v819_v8 = vpop.f32.mrf.mxu1 }
 0x11b   :  { %1136 = vst [vmem:[#allocation2 + $0x100] sm:$0xff] %v1008_v49  ;;  %1200 = vst [vmem:[#allocation2 + $0x300] sm:$0xff] %v1072_v50  ;;  %v1009_v5 = vmul.f32 %v945_v14, %v627_v56  ;;  %v1073_v6 = vmul.f32 %v945_v14, %v819_v8  ;;  %v958_v49 = vld [vmem:[%s2253_s4 + $0x170] sm:$0xff] }
 0x11c   :  { %v631_v7 = vpop.f32.mrf.mxu0  ;;  %v823_v11 = vpop.f32.mrf.mxu1 }
 0x11d   :  { %1137 = vst [vmem:[#allocation2 + $0x108] sm:$0xff] %v1009_v5  ;;  %1201 = vst [vmem:[#allocation2 + $0x308] sm:$0xff] %v1073_v6  ;;  %v1010_v13 = vmul.f32 %v946_v2, %v631_v7  ;;  %v1074_v19 = vmul.f32 %v946_v2, %v823_v11  ;;  %v959_v5 = vld [vmem:[%s2253_s4 + $0x178] sm:$0xff] }
 0x11e   :  { %v633_v10 = vpop.f32.mrf.mxu0  ;;  %v825_v17 = vpop.f32.mrf.mxu1 }
 0x11f   :  { %1138 = vst [vmem:[#allocation2 + $0x110] sm:$0xff] %v1010_v13  ;;  %1202 = vst [vmem:[#allocation2 + $0x310] sm:$0xff] %v1074_v19  ;;  %v1011_v24 = vmul.f32 %v947_v12, %v633_v10  ;;  %v1075_v25 = vmul.f32 %v947_v12, %v825_v17  ;;  %v960_v13 = vld [vmem:[%s2253_s4 + $0x180] sm:$0xff] }
 0x120   :  { %v637_v3 = vpop.f32.mrf.mxu0  ;;  %v829_v30 = vpop.f32.mrf.mxu1 }
 0x121   :  { %1139 = vst [vmem:[#allocation2 + $0x118] sm:$0xff] %v1011_v24  ;;  %1203 = vst [vmem:[#allocation2 + $0x318] sm:$0xff] %v1075_v25  ;;  %v1012_v37 = vmul.f32 %v948_v23, %v637_v3  ;;  %v1076_v41 = vmul.f32 %v948_v23, %v829_v30  ;;  %v961_v24 = vld [vmem:[%s2253_s4 + $0x188] sm:$0xff] }
 0x122   :  { %v639_v44 = vpop.f32.mrf.mxu0  ;;  %v831_v45 = vpop.f32.mrf.mxu1 }
 0x123   :  { %1140 = vst [vmem:[#allocation2 + $0x120] sm:$0xff] %v1012_v37  ;;  %1204 = vst [vmem:[#allocation2 + $0x320] sm:$0xff] %v1076_v41  ;;  %v1013_v47 = vmul.f32 %v949_v36, %v639_v44  ;;  %v1077_v16 = vmul.f32 %v949_v36, %v831_v45  ;;  %v962_v37 = vld [vmem:[%s2253_s4 + $0x190] sm:$0xff] }
 0x124   :  { %v643_v48 = vpop.f32.mrf.mxu0  ;;  %v835_v18 = vpop.f32.mrf.mxu1 }
 0x125   :  { %1141 = vst [vmem:[#allocation2 + $0x128] sm:$0xff] %v1013_v47  ;;  %1205 = vst [vmem:[#allocation2 + $0x328] sm:$0xff] %v1077_v16  ;;  %v1014_v29 = vmul.f32 %v950_v46, %v643_v48  ;;  %v1078_v32 = vmul.f32 %v950_v46, %v835_v18  ;;  %v963_v47 = vld [vmem:[%s2253_s4 + $0x198] sm:$0xff] }
 0x126   :  { %v645_v33 = vpop.f32.mrf.mxu0  ;;  %v837_v34 = vpop.f32.mrf.mxu1 }
 0x127   :  { %1142 = vst [vmem:[#allocation2 + $0x130] sm:$0xff] %v1014_v29  ;;  %1206 = vst [vmem:[#allocation2 + $0x330] sm:$0xff] %v1078_v32  ;;  %v1015_v51 = vmul.f32 %v951_v28, %v645_v33  ;;  %v1079_v39 = vmul.f32 %v951_v28, %v837_v34  ;;  %v964_v29 = vld [vmem:[%s2253_s4 + $0x1a0] sm:$0xff] }
 0x128   :  { %v649_v40 = vpop.f32.mrf.mxu0  ;;  %v841_v42 = vpop.f32.mrf.mxu1 }
 0x129   :  { %1143 = vst [vmem:[#allocation2 + $0x138] sm:$0xff] %v1015_v51  ;;  %1207 = vst [vmem:[#allocation2 + $0x338] sm:$0xff] %v1079_v39  ;;  %v1016_v54 = vmul.f32 %v952_v38, %v649_v40  ;;  %v1080_v55 = vmul.f32 %v952_v38, %v841_v42  ;;  %v965_v51 = vld [vmem:[%s2253_s4 + $0x1a8] sm:$0xff] }
 0x12a   :  { %v651_v60 = vpop.f32.mrf.mxu0  ;;  %v843_v61 = vpop.f32.mrf.mxu1 }
 0x12b   :  { %1144 = vst [vmem:[#allocation2 + $0x140] sm:$0xff] %v1016_v54  ;;  %1208 = vst [vmem:[#allocation2 + $0x340] sm:$0xff] %v1080_v55  ;;  %v1017_v0 = vmul.f32 %v953_v43, %v651_v60  ;;  %v1081_v1 = vmul.f32 %v953_v43, %v843_v61  ;;  %v966_v54 = vld [vmem:[%s2253_s4 + $0x1b0] sm:$0xff] }
 0x12c   :  { %v655_v21 = vpop.f32.mrf.mxu0  ;;  %v847_v22 = vpop.f32.mrf.mxu1 }
 0x12d   :  { %1145 = vst [vmem:[#allocation2 + $0x148] sm:$0xff] %v1017_v0  ;;  %1209 = vst [vmem:[#allocation2 + $0x348] sm:$0xff] %v1081_v1  ;;  %v1018_v26 = vmul.f32 %v954_v62, %v655_v21  ;;  %v1082_v27 = vmul.f32 %v954_v62, %v847_v22  ;;  %v967_v0 = vld [vmem:[%s2253_s4 + $0x1b8] sm:$0xff] }
 0x12e   :  { %v657_v31 = vpop.f32.mrf.mxu0  ;;  %v849_v35 = vpop.f32.mrf.mxu1 }
 0x12f   :  { %1146 = vst [vmem:[#allocation2 + $0x150] sm:$0xff] %v1018_v26  ;;  %1210 = vst [vmem:[#allocation2 + $0x350] sm:$0xff] %v1082_v27  ;;  %v1019_v53 = vmul.f32 %v955_v4, %v657_v31  ;;  %v1083_v9 = vmul.f32 %v955_v4, %v849_v35  ;;  %v968_v26 = vld [vmem:[%s2253_s4 + $0x1c0] sm:$0xff] }
 0x130   :  { %v661_v57 = vpop.f32.mrf.mxu0  ;;  %v853_v58 = vpop.f32.mrf.mxu1 }
 0x131   :  { %1147 = vst [vmem:[#allocation2 + $0x158] sm:$0xff] %v1019_v53  ;;  %1211 = vst [vmem:[#allocation2 + $0x358] sm:$0xff] %v1083_v9  ;;  %v1020_v63 = vmul.f32 %v956_v52, %v661_v57  ;;  %v1084_v15 = vmul.f32 %v956_v52, %v853_v58  ;;  %v969_v53 = vld [vmem:[%s2253_s4 + $0x1c8] sm:$0xff] }
 0x132   :  { %v663_v20 = vpop.f32.mrf.mxu0  ;;  %v855_v14 = vpop.f32.mrf.mxu1 }
 0x133   :  { %1148 = vst [vmem:[#allocation2 + $0x160] sm:$0xff] %v1020_v63  ;;  %1212 = vst [vmem:[#allocation2 + $0x360] sm:$0xff] %v1084_v15  ;;  %v1021_v50 = vmul.f32 %v957_v59, %v663_v20  ;;  %v1085_v56 = vmul.f32 %v957_v59, %v855_v14  ;;  %v970_v63 = vld [vmem:[%s2253_s4 + $0x1d0] sm:$0xff] }
 0x134   :  { %v667_v8 = vpop.f32.mrf.mxu0  ;;  %v859_v2 = vpop.f32.mrf.mxu1 }
 0x135   :  { %1149 = vst [vmem:[#allocation2 + $0x168] sm:$0xff] %v1021_v50  ;;  %1213 = vst [vmem:[#allocation2 + $0x368] sm:$0xff] %v1085_v56  ;;  %v1022_v6 = vmul.f32 %v958_v49, %v667_v8  ;;  %v1086_v7 = vmul.f32 %v958_v49, %v859_v2  ;;  %v971_v50 = vld [vmem:[%s2253_s4 + $0x1d8] sm:$0xff] }
 0x136   :  { %v669_v11 = vpop.f32.mrf.mxu0  ;;  %v861_v12 = vpop.f32.mrf.mxu1 }
 0x137   :  { %1150 = vst [vmem:[#allocation2 + $0x170] sm:$0xff] %v1022_v6  ;;  %1214 = vst [vmem:[#allocation2 + $0x370] sm:$0xff] %v1086_v7  ;;  %v1023_v19 = vmul.f32 %v959_v5, %v669_v11  ;;  %v1087_v10 = vmul.f32 %v959_v5, %v861_v12  ;;  %v972_v6 = vld [vmem:[%s2253_s4 + $0x1e0] sm:$0xff] }
 0x138   :  { %v673_v17 = vpop.f32.mrf.mxu0  ;;  %v865_v23 = vpop.f32.mrf.mxu1 }
 0x139   :  { %1151 = vst [vmem:[#allocation2 + $0x178] sm:$0xff] %v1023_v19  ;;  %1215 = vst [vmem:[#allocation2 + $0x378] sm:$0xff] %v1087_v10  ;;  %v1024_v25 = vmul.f32 %v960_v13, %v673_v17  ;;  %v1088_v3 = vmul.f32 %v960_v13, %v865_v23  ;;  %v973_v19 = vld [vmem:[%s2253_s4 + $0x1e8] sm:$0xff] }
 0x13a   :  { %v675_v30 = vpop.f32.mrf.mxu0  ;;  %v867_v36 = vpop.f32.mrf.mxu1 }
 0x13b   :  { %1152 = vst [vmem:[#allocation2 + $0x180] sm:$0xff] %v1024_v25  ;;  %1216 = vst [vmem:[#allocation2 + $0x380] sm:$0xff] %v1088_v3  ;;  %v1025_v41 = vmul.f32 %v961_v24, %v675_v30  ;;  %v1089_v44 = vmul.f32 %v961_v24, %v867_v36  ;;  %v974_v25 = vld [vmem:[%s2253_s4 + $0x1f0] sm:$0xff] }
 0x13c   :  { %v679_v45 = vpop.f32.mrf.mxu0  ;;  %v871_v46 = vpop.f32.mrf.mxu1 }
 0x13d   :  { %1153 = vst [vmem:[#allocation2 + $0x188] sm:$0xff] %v1025_v41  ;;  %1217 = vst [vmem:[#allocation2 + $0x388] sm:$0xff] %v1089_v44  ;;  %v1026_v16 = vmul.f32 %v962_v37, %v679_v45  ;;  %v1090_v48 = vmul.f32 %v962_v37, %v871_v46  ;;  %v975_v41 = vld [vmem:[%s2253_s4 + $0x1f8] sm:$0xff] }
 0x13e   :  { %v681_v18 = vpop.f32.mrf.mxu0  ;;  %v873_v28 = vpop.f32.mrf.mxu1 }
 0x13f   :  { %1154 = vst [vmem:[#allocation2 + $0x190] sm:$0xff] %v1026_v16  ;;  %1218 = vst [vmem:[#allocation2 + $0x390] sm:$0xff] %v1090_v48  ;;  %v1027_v32 = vmul.f32 %v963_v47, %v681_v18  ;;  %v1091_v33 = vmul.f32 %v963_v47, %v873_v28 }
 0x140   :  { %v685_v34 = vpop.f32.mrf.mxu0  ;;  %v877_v38 = vpop.f32.mrf.mxu1 }
 0x141   :  { %1155 = vst [vmem:[#allocation2 + $0x198] sm:$0xff] %v1027_v32  ;;  %1219 = vst [vmem:[#allocation2 + $0x398] sm:$0xff] %v1091_v33  ;;  %v1028_v39 = vmul.f32 %v964_v29, %v685_v34  ;;  %v1092_v40 = vmul.f32 %v964_v29, %v877_v38 }
 0x142   :  { %v687_v42 = vpop.f32.mrf.mxu0  ;;  %v879_v43 = vpop.f32.mrf.mxu1 }
 0x143   :  { %1156 = vst [vmem:[#allocation2 + $0x1a0] sm:$0xff] %v1028_v39  ;;  %1220 = vst [vmem:[#allocation2 + $0x3a0] sm:$0xff] %v1092_v40  ;;  %v1029_v55 = vmul.f32 %v965_v51, %v687_v42  ;;  %v1093_v60 = vmul.f32 %v965_v51, %v879_v43 }
 0x144   :  { %v691_v61 = vpop.f32.mrf.mxu0  ;;  %v883_v62 = vpop.f32.mrf.mxu1 }
 0x145   :  { %1157 = vst [vmem:[#allocation2 + $0x1a8] sm:$0xff] %v1029_v55  ;;  %1221 = vst [vmem:[#allocation2 + $0x3a8] sm:$0xff] %v1093_v60  ;;  %v1030_v1 = vmul.f32 %v966_v54, %v691_v61  ;;  %v1094_v21 = vmul.f32 %v966_v54, %v883_v62 }
 0x146   :  { %v693_v22 = vpop.f32.mrf.mxu0  ;;  %v885_v4 = vpop.f32.mrf.mxu1 }
 0x147   :  { %1158 = vst [vmem:[#allocation2 + $0x1b0] sm:$0xff] %v1030_v1  ;;  %1222 = vst [vmem:[#allocation2 + $0x3b0] sm:$0xff] %v1094_v21  ;;  %v1031_v27 = vmul.f32 %v967_v0, %v693_v22  ;;  %v1095_v31 = vmul.f32 %v967_v0, %v885_v4 }
 0x148   :  { %v697_v35 = vpop.f32.mrf.mxu0  ;;  %v889_v52 = vpop.f32.mrf.mxu1 }
 0x149   :  { %1159 = vst [vmem:[#allocation2 + $0x1b8] sm:$0xff] %v1031_v27  ;;  %1223 = vst [vmem:[#allocation2 + $0x3b8] sm:$0xff] %v1095_v31  ;;  %v1032_v9 = vmul.f32 %v968_v26, %v697_v35  ;;  %v1096_v57 = vmul.f32 %v968_v26, %v889_v52 }
 0x14a   :  { %v699_v58 = vpop.f32.mrf.mxu0  ;;  %v891_v59 = vpop.f32.mrf.mxu1 }
 0x14b   :  { %1160 = vst [vmem:[#allocation2 + $0x1c0] sm:$0xff] %v1032_v9  ;;  %1224 = vst [vmem:[#allocation2 + $0x3c0] sm:$0xff] %v1096_v57  ;;  %v1033_v15 = vmul.f32 %v969_v53, %v699_v58  ;;  %v1097_v20 = vmul.f32 %v969_v53, %v891_v59 }
 0x14c   :  { %v703_v14 = vpop.f32.mrf.mxu0  ;;  %v895_v49 = vpop.f32.mrf.mxu1 }
 0x14d   :  { %1161 = vst [vmem:[#allocation2 + $0x1c8] sm:$0xff] %v1033_v15  ;;  %1225 = vst [vmem:[#allocation2 + $0x3c8] sm:$0xff] %v1097_v20  ;;  %v1034_v56 = vmul.f32 %v970_v63, %v703_v14  ;;  %v1098_v8 = vmul.f32 %v970_v63, %v895_v49 }
 0x14e   :  { %v705_v2 = vpop.f32.mrf.mxu0  ;;  %v897_v5 = vpop.f32.mrf.mxu1 }
 0x14f   :  { %1162 = vst [vmem:[#allocation2 + $0x1d0] sm:$0xff] %v1034_v56  ;;  %1226 = vst [vmem:[#allocation2 + $0x3d0] sm:$0xff] %v1098_v8  ;;  %v1035_v7 = vmul.f32 %v971_v50, %v705_v2  ;;  %v1099_v11 = vmul.f32 %v971_v50, %v897_v5 }
 0x150   :  { %v709_v12 = vpop.f32.mrf.mxu0  ;;  %v901_v13 = vpop.f32.mrf.mxu1 }
 0x151   :  { %1163 = vst [vmem:[#allocation2 + $0x1d8] sm:$0xff] %v1035_v7  ;;  %1227 = vst [vmem:[#allocation2 + $0x3d8] sm:$0xff] %v1099_v11  ;;  %v1036_v10 = vmul.f32 %v972_v6, %v709_v12  ;;  %v1100_v17 = vmul.f32 %v972_v6, %v901_v13 }
 0x152   :  { %v711_v23 = vpop.f32.mrf.mxu0  ;;  %v903_v24 = vpop.f32.mrf.mxu1 }
 0x153   :  { %1164 = vst [vmem:[#allocation2 + $0x1e0] sm:$0xff] %v1036_v10  ;;  %1228 = vst [vmem:[#allocation2 + $0x3e0] sm:$0xff] %v1100_v17  ;;  %v1037_v3 = vmul.f32 %v973_v19, %v711_v23  ;;  %v1101_v30 = vmul.f32 %v973_v19, %v903_v24 }
 0x154   :  { %v715_v36 = vpop.f32.mrf.mxu0  ;;  %v907_v37 = vpop.f32.mrf.mxu1 }
 0x155   :  { %1165 = vst [vmem:[#allocation2 + $0x1e8] sm:$0xff] %v1037_v3  ;;  %1229 = vst [vmem:[#allocation2 + $0x3e8] sm:$0xff] %v1101_v30  ;;  %v1038_v44 = vmul.f32 %v974_v25, %v715_v36  ;;  %v1102_v45 = vmul.f32 %v974_v25, %v907_v37 }
 0x156   :  { %v717_v46 = vpop.f32.mrf.mxu0  ;;  %v909_v47 = vpop.f32.mrf.mxu1 }
 0x157   :  { %1166 = vst [vmem:[#allocation2 + $0x1f0] sm:$0xff] %v1038_v44  ;;  %1230 = vst [vmem:[#allocation2 + $0x3f0] sm:$0xff] %v1102_v45  ;;  %v1039_v16 = vmul.f32 %v975_v41, %v717_v46  ;;  %v1103_v48 = vmul.f32 %v975_v41, %v909_v47 }
 0x159   :  { %1167 = vst [vmem:[#allocation2 + $0x1f8] sm:$0xff] %v1039_v16  ;;  %1231 = vst [vmem:[#allocation2 + $0x3f8] sm:$0xff] %v1103_v48 }
 0x15a   :  { %1355 = shalt.err (!%p1352_p4)
}
 0x15b   :  { %s1368_s4 = smov 256   ;;  %s1369_s21 = smov 16  }
 0x15c   :  { %1243 = dma.vmem_to_hbm [thread:$0]  %s1238_s17, 16384, %s2254_s5, [#allocation3], %s1368_s4, %s1368_s4, %s1369_s21  }
 0x15d   :  { %1364 = dma.done.wait [#allocation3], 16384  }
 0x15e   :  { %1365 = vsyncadd [#allocation3], 4294950912 }
 0x15f   :  { %1247 = vsyncpa [#allocation3], 1 }

</bundles_post_ra>
